<compile_context>
chip_gen: v5e
topology: v5e:2x2
jax: 0.10.0
libtpu: 0.0.40
codegen_flags: <defaults>
</compile_context>

<pallas_src>
import functools

import jax
import jax.numpy as jnp
from jax.experimental import pallas as pl
from jax.experimental.pallas import tpu as pltpu

LANES = 128
SUBLANE_PAD = 16          # pad flat length to a multiple of 16*128 so the 2-D
                          # slab is sublane-aligned even for bf16 inputs
TARGET_BLOCK_ROWS = 4096  # (4096, 128) f32 = 2 MiB per input block; 2 inputs x
                          # 2 pipeline buffers = 8 MiB VMEM (safe on v5e/v6e/v7x)
PAD_SENTINEL = -1e9       # focal loss of (x = -1e9, t = 0) is exactly 0


def _modulating_factor(q, gamma):
    """(1 - p_t) ** gamma, specialized to iterated multiply for integer gamma."""
    g = float(gamma)
    if g == int(g) and 0 <= int(g) <= 8:
        g = int(g)
        if g == 0:
            return jnp.ones_like(q)
        mod = q
        for _ in range(g - 1):
            mod = mod * q
        return mod
    return q ** gamma


def _focal_loss_kernel(scale_ref, x_ref, t_ref, out_ref, acc_ref, *,
                       gamma, alpha, block_rows, valid_rows, mask_last):
    i = pl.program_id(0)
    nprog = pl.num_programs(0)

    @pl.when(i == 0)
    def _():
        acc_ref[...] = jnp.zeros_like(acc_ref)

    x = x_ref[...].astype(jnp.float32)
    t = t_ref[...].astype(jnp.float32)

    # Numerically-stable BCE-with-logits (== F.binary_cross_entropy_with_logits):
    #   ce = max(x, 0) - x*t + log1p(exp(-|x|)) = -log(p_t)  for t in {0, 1}
    ce = jnp.maximum(x, 0.0) - x * t + jnp.log1p(jnp.exp(-jnp.abs(x)))
    # p_t = p*t + (1-p)*(1-t) == exp(-ce) for hard (0/1) targets; this removes
    # the sigmoid (exp + reciprocal) from the per-element EUP work.
    p_t = jnp.exp(-ce)
    loss = ce * _modulating_factor(1.0 - p_t, gamma)
    if alpha >= 0:
        alpha_t = alpha * t + (1.0 - alpha) * (1.0 - t)
        loss = alpha_t * loss

    def _accumulate(v):
        # Fold the (block_rows, 128) tile into the (8, 128) vreg accumulator
        # with pure VPU adds; the cross-lane reduce happens once at the end.
        acc_ref[...] += v.reshape(block_rows // 8, 8, LANES).sum(axis=0)

    if mask_last:
        # Only the final (partial) grid block can read out-of-bounds rows;
        # mask them there and keep every other block mask-free.
        @pl.when(i < nprog - 1)
        def _():
            _accumulate(loss)

        @pl.when(i == nprog - 1)
        def _():
            row = (jax.lax.broadcasted_iota(jnp.int32, loss.shape, 0)
                   + i * block_rows)
            _accumulate(jnp.where(row < valid_rows, loss, 0.0))
    else:
        _accumulate(loss)

    @pl.when(i == nprog - 1)
    def _():
        out_ref[0, 0] = jnp.sum(acc_ref[...]) * scale_ref[0]


def focal_loss(pred, target, *, lambda_weight=1.0, gamma=2.0, alpha=0.25,
               reduction="mean"):
    """JAX/Pallas equivalent of FocalLoss(...).forward(pred, target)."""
    assert reduction in ("mean", "sum")
    # TODO(synk): reduction='none' (and the optional weight/avg_factor args of
    # FocalLoss.sigmoid_focal_loss) would skip the in-kernel reduction and
    # return the elementwise slab; not exercised by FocalLoss.forward defaults.
    assert pred.shape == target.shape

    n_valid = int(pred.size)
    pad_unit = SUBLANE_PAD * LANES
    pad = (-n_valid) % pad_unit

    # Keep native dtype (e.g. bf16) to halve HBM reads; cast in-register.
    x = jnp.ravel(pred)
    t = jnp.ravel(target)
    if pad:
        # Sentinel padding makes the focal loss of padded elements exactly 0,
        # so no per-element validity mask is needed in the hot loop.
        x = jnp.concatenate([x, jnp.full((pad,), PAD_SENTINEL, dtype=x.dtype)])
        t = jnp.concatenate([t, jnp.zeros((pad,), dtype=t.dtype)])

    rows = (n_valid + pad) // LANES
    x = x.reshape(rows, LANES)
    t = t.reshape(rows, LANES)

    block_rows = min(TARGET_BLOCK_ROWS, rows)
    num_blocks = pl.cdiv(rows, block_rows)
    mask_last = (rows % block_rows) != 0

    scale = float(lambda_weight)
    if reduction == "mean":
        scale /= float(n_valid)
    scale_arr = jnp.asarray([scale], dtype=jnp.float32)

    kernel = functools.partial(
        _focal_loss_kernel,
        gamma=float(gamma),
        alpha=float(alpha),
        block_rows=block_rows,
        valid_rows=rows,
        mask_last=mask_last,
    )

    out = pl.pallas_call(
        kernel,
        out_shape=jax.ShapeDtypeStruct((1, 1), jnp.float32),
        grid_spec=pltpu.PrefetchScalarGridSpec(
            num_scalar_prefetch=1,
            grid=(num_blocks,),
            in_specs=[
                pl.BlockSpec((block_rows, LANES), lambda i, s: (i, 0)),
                pl.BlockSpec((block_rows, LANES), lambda i, s: (i, 0)),
            ],
            out_specs=pl.BlockSpec((1, 1), lambda i, s: (0, 0),
                                   memory_space=pltpu.SMEM),
            scratch_shapes=[pltpu.VMEM((8, LANES), jnp.float32)],
        ),
        compiler_params=pltpu.CompilerParams(
            dimension_semantics=("arbitrary",)),
        # TODO(synk): on v7x, split the grid across the two TensorCores
        # (leading "parallel" axis + per-core partial sums) for up to ~2x.
    )(scale_arr, x, t)
    return out[0, 0]


def _focal_loss_ref(pred, target, *, lambda_weight=1.0, gamma=2.0, alpha=0.25,
                    reduction="mean"):
    # Pure-JAX reference mirroring the PyTorch code path (sigmoid + p_t + pow).
    x = pred.astype(jnp.float32)
    t = target.astype(jnp.float32)
    p = jax.nn.sigmoid(x)
    ce = jnp.maximum(x, 0.0) - x * t + jnp.log1p(jnp.exp(-jnp.abs(x)))
    p_t = p * t + (1 - p) * (1 - t)
    loss = ce * (1 - p_t) ** gamma
    if alpha >= 0:
        alpha_t = alpha * t + (1 - alpha) * (1 - t)
        loss = alpha_t * loss
    red = jnp.mean(loss) if reduction == "mean" else jnp.sum(loss)
    return lambda_weight * red


if __name__ == "__main__":
    key = jax.random.PRNGKey(0)
    k1, k2, k3, k4 = jax.random.split(key, 4)

    # Test 1: small dense-detection map, default FocalLoss config (mean).
    pred = jax.random.normal(k1, (2, 4, 16, 16), dtype=jnp.float32)
    target = (jax.random.uniform(k2, (2, 4, 16, 16)) > 0.8).astype(jnp.float32)
    out = focal_loss(pred, target, lambda_weight=1.0, gamma=2.0, alpha=0.25,
                     reduction="mean")
    out = jax.block_until_ready(out)
    ref = _focal_loss_ref(pred, target, lambda_weight=1.0, gamma=2.0,
                          alpha=0.25, reduction="mean")
    assert jnp.allclose(out, ref, rtol=1e-5, atol=1e-6), (out, ref)

    # Test 2: bf16 inputs, non-aligned size (exercises sentinel padding,
    # multi-block grid, masked partial last block) with sum reduction.
    shape2 = (3, 11, 130, 129)
    pred2 = jax.random.normal(k3, shape2, dtype=jnp.float32).astype(jnp.bfloat16)
    target2 = (jax.random.uniform(k4, shape2) > 0.7).astype(jnp.bfloat16)
    out2 = focal_loss(pred2, target2, lambda_weight=0.5, gamma=2.0, alpha=0.25,
                      reduction="sum")
    out2 = jax.block_until_ready(out2)
    ref2 = _focal_loss_ref(pred2, target2, lambda_weight=0.5, gamma=2.0,
                           alpha=0.25, reduction="sum")
    assert jnp.allclose(out2, ref2, rtol=1e-4, atol=1e-2), (out2, ref2)

    print("KERNEL_OK")
</pallas_src>

<mosaic_0001>
module attributes {stable_mosaic.version = 11 : i64} {
  func.func @_focal_loss_kernel(%arg0: i32, %arg1: memref<1xf32, #tpu.memory_space<smem>>, %arg2: memref<16x128xf32, #tpu.memory_space<vmem>>, %arg3: memref<16x128xf32, #tpu.memory_space<vmem>>, %arg4: memref<1x1xf32, #tpu.memory_space<smem>>, %arg5: memref<8x128xf32, #tpu.memory_space<vmem>>) attributes {dimension_semantics = [#tpu.dimension_semantics<arbitrary>], iteration_bounds = array<i64: 1>, scalar_prefetch = 1 : i64, scratch_operands = 1 : i64, tpu.core_type = #tpu.core_type<tc>, window_params = [{transform_indices = @transform_0, window_bounds = array<i64: 16, 128>}, {transform_indices = @transform_1, window_bounds = array<i64: 16, 128>}, {transform_indices = @transform_2, window_bounds = array<i64: 1, 1>}]} {
    %c0_i32 = arith.constant 0 : i32
    %0 = arith.cmpi eq, %arg0, %c0_i32 : i32
    %1 = arith.extui %0 : i1 to i32
    %c0_i32_0 = arith.constant 0 : i32
    %2 = arith.cmpi ne, %1, %c0_i32_0 : i32
    scf.if %2 {
      %cst_17 = arith.constant 0.000000e+00 : f32
      %38 = vector.broadcast %cst_17 : f32 to vector<8x128xf32>
      %c0_18 = arith.constant 0 : index
      %c0_19 = arith.constant 0 : index
      %39 = vector.load %arg5[%c0_18, %c0_19] : memref<8x128xf32, #tpu.memory_space<vmem>>, vector<8x128xf32>
      tpu.vector_store %arg5[%c0_18, %c0_19], %38 {strides = array<i32>} : memref<8x128xf32, #tpu.memory_space<vmem>>, vector<8x128xf32>,
    } else {
    }
    %c0 = arith.constant 0 : index
    %c0_1 = arith.constant 0 : index
    %3 = vector.load %arg2[%c0, %c0_1] : memref<16x128xf32, #tpu.memory_space<vmem>>, vector<16x128xf32>
    %c0_2 = arith.constant 0 : index
    %c0_3 = arith.constant 0 : index
    %4 = vector.load %arg3[%c0_2, %c0_3] : memref<16x128xf32, #tpu.memory_space<vmem>>, vector<16x128xf32>
    %cst = arith.constant 0.000000e+00 : f32
    %5 = vector.broadcast %cst : f32 to vector<16x128xf32>
    %6 = arith.maximumf %3, %5 : vector<16x128xf32>
    %7 = arith.mulf %3, %4 : vector<16x128xf32>
    %8 = arith.subf %6, %7 : vector<16x128xf32>
    %9 = math.absf %3 : vector<16x128xf32>
    %cst_4 = arith.constant 0.000000e+00 : f32
    %10 = vector.broadcast %cst_4 : f32 to vector<16x128xf32>
    %11 = arith.subf %10, %9 : vector<16x128xf32>
    %12 = math.exp %11 : vector<16x128xf32>
    %13 = math.log1p %12 : vector<16x128xf32>
    %14 = arith.addf %8, %13 : vector<16x128xf32>
    %cst_5 = arith.constant 0.000000e+00 : f32
    %15 = vector.broadcast %cst_5 : f32 to vector<16x128xf32>
    %16 = arith.subf %15, %14 : vector<16x128xf32>
    %17 = math.exp %16 : vector<16x128xf32>
    %cst_6 = arith.constant 1.000000e+00 : f32
    %18 = vector.broadcast %cst_6 : f32 to vector<16x128xf32>
    %19 = arith.subf %18, %17 : vector<16x128xf32>
    %20 = arith.mulf %19, %19 : vector<16x128xf32>
    %21 = arith.mulf %14, %20 : vector<16x128xf32>
    %cst_7 = arith.constant 2.500000e-01 : f32
    %22 = vector.broadcast %cst_7 : f32 to vector<16x128xf32>
    %23 = arith.mulf %22, %4 : vector<16x128xf32>
    %cst_8 = arith.constant 1.000000e+00 : f32
    %24 = vector.broadcast %cst_8 : f32 to vector<16x128xf32>
    %25 = arith.subf %24, %4 : vector<16x128xf32>
    %cst_9 = arith.constant 7.500000e-01 : f32
    %26 = vector.broadcast %cst_9 : f32 to vector<16x128xf32>
    %27 = arith.mulf %26, %25 : vector<16x128xf32>
    %28 = arith.addf %23, %27 : vector<16x128xf32>
    %29 = arith.mulf %28, %21 : vector<16x128xf32>
    %c0_10 = arith.constant 0 : index
    %c0_11 = arith.constant 0 : index
    %30 = vector.load %arg5[%c0_10, %c0_11] : memref<8x128xf32, #tpu.memory_space<vmem>>, vector<8x128xf32>
    %31 = vector.shape_cast %29 : vector<16x128xf32> to vector<2x8x128xf32>
    %cst_12 = arith.constant dense<0.000000e+00> : vector<8x128xf32>
    %32 = vector.multi_reduction <add>, %31, %cst_12 [0] : vector<2x8x128xf32> to vector<8x128xf32>
    %33 = arith.addf %30, %32 : vector<8x128xf32>
    %c0_13 = arith.constant 0 : index
    %c0_14 = arith.constant 0 : index
    %34 = vector.load %arg5[%c0_13, %c0_14] : memref<8x128xf32, #tpu.memory_space<vmem>>, vector<8x128xf32>
    tpu.vector_store %arg5[%c0_13, %c0_14], %33 {strides = array<i32>} : memref<8x128xf32, #tpu.memory_space<vmem>>, vector<8x128xf32>,
    %c0_i32_15 = arith.constant 0 : i32
    %35 = arith.cmpi eq, %arg0, %c0_i32_15 : i32
    %36 = arith.extui %35 : i1 to i32
    %c0_i32_16 = arith.constant 0 : i32
    %37 = arith.cmpi ne, %36, %c0_i32_16 : i32
    scf.if %37 {
      %c0_17 = arith.constant 0 : index
      %c0_18 = arith.constant 0 : index
      %38 = vector.load %arg5[%c0_17, %c0_18] : memref<8x128xf32, #tpu.memory_space<vmem>>, vector<8x128xf32>
      %39 = vector.shape_cast %38 : vector<8x128xf32> to vector<1x8x128xf32>
      %cst_19 = arith.constant dense<0.000000e+00> : vector<1xf32>
      %40 = vector.multi_reduction <add>, %39, %cst_19 [1, 2] : vector<1x8x128xf32> to vector<1xf32>
      %41 = vector.shape_cast %40 : vector<1xf32> to vector<1x1x1xf32>
      %42 = vector.extract %41[0, 0, 0] : f32 from vector<1x1x1xf32>
      %c0_20 = arith.constant 0 : index
      %43 = memref.load %arg1[%c0_20] : memref<1xf32, #tpu.memory_space<smem>>
      %44 = arith.mulf %42, %43 : f32
      %c0_21 = arith.constant 0 : index
      %c0_22 = arith.constant 0 : index
      %45 = memref.load %arg4[%c0_21, %c0_22] : memref<1x1xf32, #tpu.memory_space<smem>>
      memref.store %44, %arg4[%c0_21, %c0_22] : memref<1x1xf32, #tpu.memory_space<smem>>
    } else {
    }
    return
  }
  func.func @transform_0(%arg0: i32, %arg1: memref<1xf32, #tpu.memory_space<smem>>) -> (i32, i32) {
    %c0_i32 = arith.constant 0 : i32
    %c0_i32_0 = arith.constant 0 : i32
    return %arg0, %c0_i32 : i32, i32
  }
  func.func @transform_1(%arg0: i32, %arg1: memref<1xf32, #tpu.memory_space<smem>>) -> (i32, i32) {
    %c0_i32 = arith.constant 0 : i32
    %c0_i32_0 = arith.constant 0 : i32
    return %arg0, %c0_i32 : i32, i32
  }
  func.func @transform_2(%arg0: i32, %arg1: memref<1xf32, #tpu.memory_space<smem>>) -> (i32, i32) {
    %c0_i32 = arith.constant 0 : i32
    %c0_i32_0 = arith.constant 0 : i32
    %c0_i32_1 = arith.constant 0 : i32
    return %c0_i32, %c0_i32_0 : i32, i32
  }
}

</mosaic_0001>

<bundles_post_ra>
// kernel: tpu_custom_call.1
= control target key start
LH: loop header
LB: loop body
LE: loop exit
PB: predicated region body
PF: predicated region fallthrough
CT: control target
= control target key end

     0   :  { %9 = vsyncpa [#allocation6], 0  ;;  %s271_s0 = inlined_call_operand.<no memory space> [shape: f32[1], index: 0, kind: input, shape index: {}]   ;;  %s272_s1 = inlined_call_operand.hbm [shape: f32[16,128], index: 1, kind: input, shape index: {}]   ;;  %s273_s2 = inlined_call_operand.hbm [shape: f32[16,128], index: 2, kind: input, shape index: {}]   ;;  %s274_s3 = inlined_call_operand.hbm [shape: f32[1,1], index: 3, kind: output, shape index: {}]  }
   0x1   :  { %10 = vsyncpa [#allocation9], 0 }
   0x2   :  { %11 = vsyncpa [#allocation7], 0  ;;  %s16_s14 = sshll.u32 %s272_s1, 4  ;;  %s234_s15 = smov [#allocation5]   ;;  %s17_s14 = int_to_ptr.hbm [resolvable:$true] %s16_s14 }
   0x3   :  { %s18_s16 = sshll.u32 %s234_s15, 4  ;;  %s29_s19 = sshll.u32 %s273_s2, 4  ;;  %s19_s16 = int_to_ptr.vmem [resolvable:$true] %s18_s16  ;;  %s30_s19 = int_to_ptr.hbm [resolvable:$true] %s29_s19 }
   0x4   :  { %s235_s20 = smov 128   ;;  %s236_s21 = smov 8  }
   0x5   :  { %24 = dma.hbm_to_vmem [thread:$0]  %s17_s14, 256, %s19_s16, [#allocation6], %s235_s20, %s235_s20, %s236_s21  }
   0x6   :  { %s237_s22 = smov [#allocation8]  }
   0x7   :  { %s31_s23 = sshll.u32 %s237_s22, 4  ;;  %s32_s23 = int_to_ptr.vmem [resolvable:$true] %s31_s23 }
   0x8   :  { %37 = dma.hbm_to_vmem [thread:$0]  %s30_s19, 256, %s32_s23, [#allocation9], %s235_s20, %s235_s20, %s236_s21  }
   0x9   :  { %228 = dma.done.wait [#allocation6], 256  }
   0xa   :  { %229 = vsyncadd [#allocation6], 4294967040 }
   0xb   :  { %230 = dma.done.wait [#allocation9], 256  }
   0xc   :  { %231 = vsyncadd [#allocation9], 4294967040  ;;  %v51_v0 = vld [vmem:[#allocation5] sm:$0xff]  ;;  %v52_v1 = vld [vmem:[#allocation5 + $0x8] sm:$0xff]  ;;  %s137_s24 = sshll.u32 %s274_s3, 4  ;;  %s238_s29 = smov [#allocation10]   ;;  %s138_s24 = int_to_ptr.hbm [resolvable:$true] %s137_s24 }
   0xd   :  { %v61_v2 = vand.u32 2147483647, %v51_v0  ;;  %v62_v3 = vand.u32 2147483647, %v52_v1  ;;  %v53_v12 = vld [vmem:[#allocation8] sm:$0xff]  ;;  %v54_v15 = vld [vmem:[#allocation8 + $0x8] sm:$0xff] }
   0xe   :  { %v55_v17 = vmax.f32 %v51_v0, 0.0  ;;  %v57_v18 = vmul.f32 %v53_v12, %v51_v0  ;;  %v56_v21 = vmax.f32 %v52_v1, 0.0  ;;  %v58_v22 = vmul.f32 %v54_v15, %v52_v1 }
   0xf   :  { %v63_v4 = vsub.f32 0.0, %v61_v2  ;;  %v64_v5 = vsub.f32 0.0, %v62_v3  ;;  %v103_v40 = vsub.f32 1.0, %v53_v12  ;;  %v104_v41 = vsub.f32 1.0, %v54_v15 }
  0x10   :  { %v59_v26 = vsub.f32 %v55_v17, %v57_v18  ;;  %v60_v29 = vsub.f32 %v56_v21, %v58_v22  ;;  %v101_v42 = vmul.f32 0.25, %v53_v12  ;;  %v102_v45 = vmul.f32 0.25, %v54_v15 }
  0x11   :  { %v65_v6 = vmul.f32 1.442695, %v63_v4  ;;  %v67_v7 = vmul.f32 1.442695, %v64_v5  ;;  %v105_v43 = vmul.f32 0.75, %v103_v40  ;;  %v106_v46 = vmul.f32 0.75, %v104_v41 }
  0x13   :  { %156 = vpow2.f32 %v65_v6  ;;  %v107_v51 = vadd.f32 %v105_v43, %v101_v42  ;;  %v108_v53 = vadd.f32 %v106_v46, %v102_v45 }
  0x14   :  { %158 = vpow2.f32 %v67_v7 }
  0x19   :  { %v157_v8 = vpop.eup %156 }
  0x1a   :  { %v159_v9 = vpop.eup %158  ;;  %v69_v10 = vadd.f32 1.0, %v157_v8  ;;  %v72_v11 = vmul.f32 -0.5, %v157_v8  ;;  %v75_v19 = vand.u32 2147483647, %v157_v8 }
  0x1b   :  { %v78_v13 = vadd.f32 1.0, %v159_v9  ;;  %v81_v14 = vmul.f32 -0.5, %v159_v9  ;;  %v84_v23 = vand.u32 2147483647, %v159_v9 }
  0x1c   :  { %160 = vlog2.f32 %v69_v10  ;;  %v73_v16 = vadd.f32 1.0, %v72_v11  ;;  %vm76_vm0 = vcmp.lt.f32.partialorder %v75_v19, 0.0004427343 }
  0x1d   :  { %162 = vlog2.f32 %v78_v13  ;;  %v82_v20 = vadd.f32 1.0, %v81_v14  ;;  %vm85_vm1 = vcmp.lt.f32.partialorder %v84_v23, 0.0004427343 }
  0x1e   :  { %v74_v24 = vmul.f32 %v157_v8, %v73_v16 }
  0x1f   :  { %v83_v27 = vmul.f32 %v159_v9, %v82_v20 }
  0x22   :  { %v161_v25 = vpop.eup %160 }
  0x23   :  { %v163_v28 = vpop.eup %162  ;;  %v71_v30 = vmul.f32 0.6931472, %v161_v25 }
  0x24   :  { %v80_v31 = vmul.f32 0.6931472, %v163_v28 }
  0x25   :  { %v77_v32 = vsel %vm76_vm0, %v74_v24, %v71_v30 }
  0x26   :  { %v86_v33 = vsel %vm85_vm1, %v83_v27, %v80_v31  ;;  %v87_v34 = vadd.f32 %v77_v32, %v59_v26 }
  0x27   :  { %v88_v35 = vadd.f32 %v86_v33, %v60_v29 }
  0x28   :  { %v89_v36 = vsub.f32 0.0, %v87_v34 }
  0x29   :  { %v90_v37 = vsub.f32 0.0, %v88_v35 }
  0x2a   :  { %v91_v38 = vmul.f32 1.442695, %v89_v36 }
  0x2b   :  { %v93_v39 = vmul.f32 1.442695, %v90_v37 }
  0x2c   :  { %164 = vpow2.f32 %v91_v38 }
  0x2d   :  { %166 = vpow2.f32 %v93_v39 }
  0x32   :  { %v165_v44 = vpop.eup %164 }
  0x33   :  { %v167_v47 = vpop.eup %166  ;;  %v95_v48 = vsub.f32 1.0, %v165_v44 }
  0x34   :  { %v96_v49 = vsub.f32 1.0, %v167_v47 }
  0x35   :  { %v97_v50 = vmul.f32 %v95_v48, %v95_v48 }
  0x36   :  { %v98_v52 = vmul.f32 %v96_v49, %v96_v49 }
  0x37   :  { %v99_v54 = vmul.f32 %v97_v50, %v87_v34 }
  0x38   :  { %v100_v55 = vmul.f32 %v98_v52, %v88_v35 }
  0x39   :  { %v109_v56 = vmul.f32 %v107_v51, %v99_v54 }
  0x3a   :  { %v110_v57 = vmul.f32 %v108_v53, %v100_v55 }
  0x3c   :  { %v112_v58 = vadd.f32 %v110_v57, %v109_v56 }
  0x3e   :  { %119 = vadd.xlane.f32.xlu0 %v112_v58 }
  0xb1   :  { %v120_v59 = vpop.xlane.xlu0 %119 }
  0xb2   :  { %v121_v60 = vrot.slane %v120_v59, 4 }
  0xb4   :  { %v122_v61 = vadd.f32 %v121_v60, %v120_v59 }
  0xb6   :  { %v123_v62 = vrot.slane %v122_v61, 2 }
  0xb8   :  { %v124_v63 = vadd.f32 %v123_v62, %v122_v61 }
  0xba   :  { %v125_v0 = vrot.slane %v124_v63, 1 }
  0xbc   :  { %v126_v1 = vadd.f32 %v125_v0, %v124_v63 }
  0xbe   :  { %149 = vpush %v126_v1 }
  0xef   :  { %s150_s25 = spop %149 }
  0xf0   :  { %s129_s28 = smul.f32 %s150_s25, %s271_s0 }
  0xf2   :  { %131 = sst [smem:[#allocation10]] %s129_s28 }
  0xf3   :  { %140 = dma.smem_to_hbm %s238_s29, 16, %s138_s24, [#allocation7]  }
  0xf4   :  { %232 = dma.done.wait [#allocation7], 16  }
  0xf5   :  { %233 = vsyncadd [#allocation7], 4294967280 }
  0xf6   :  { %145 = sfence }
  0xf7   :  { %146 = vsyncpa [#allocation6], 1 }
  0xf8   :  { %147 = vsyncpa [#allocation9], 1 }
  0xf9   :  { %148 = vsyncpa [#allocation7], 1 }

</bundles_post_ra>
